<compile_context>
chip_gen: v5e
topology: v5e:2x2
jax: 0.10.0
libtpu: 0.0.40
codegen_flags: <defaults>
</compile_context>

<pallas_src>
import math

import jax
import jax.numpy as jnp
from jax.experimental import pallas as pl
from jax.experimental.pallas import tpu as pltpu

# ----------------------------- config ---------------------------------------
B = 2                      # batch
S_NL = 8                   # nl_len
S_AST = 16                 # ast_len
D_MODEL = 48               # d_model
NUM_HEADS = 6              # heads in decoder_attn
MAX_SIMPLE_NAME_LEN = 10   # copy vocab size
NL_VOCAB = 40              # total nl vocab
V_GEN = NL_VOCAB - MAX_SIMPLE_NAME_LEN   # generate-vocab size (30)
EPS = 1e-9


# ------------------------- fused Pallas kernel -------------------------------
def _pointer_generator_kernel(dec_out_ref,      # (1, Snl, D)
                              dec_attn_ref,     # (1, H, Snl, Sast)
                              mem_ref,          # (1, Sast, D)
                              nl_emb_ref,       # (1, Snl, D)
                              nl_conv_ref,      # (1, Sast, Mname)
                              sem_mask_ref,     # (1, 1, Sast) int32
                              w_vocab_ref,      # (D, Vgen)
                              b_vocab_ref,      # (1, Vgen)
                              wg_ref,           # (3, D)  rows = [ctx | dec | nl] of W_gen
                              b_gen_ref,        # (1, 1)
                              out_ref):         # (1, Snl, Vgen + Mname)
    # ---- head-sum + semantic masking of the cross-attention ---------------
    attn = jnp.sum(dec_attn_ref[0], axis=0)                      # [Snl, Sast]
    sem = sem_mask_ref[0]                                         # [1, Sast]
    attn = jnp.where(sem == 0, 0.0, attn)                         # masked_fill(==0, 0)

    # ---- p_vocab = softmax(Linear(decoder_output)) -------------------------
    dec = dec_out_ref[0]                                          # [Snl, D]
    logits_v = jnp.dot(dec, w_vocab_ref[...],
                       preferred_element_type=jnp.float32) + b_vocab_ref[...]
    mv = jnp.max(logits_v, axis=-1, keepdims=True)
    ev = jnp.exp(logits_v - mv)
    p_vocab = ev * pl.reciprocal(jnp.sum(ev, axis=-1, keepdims=True), approx=True)

    # ---- context vector + p_gen (Linear(3D -> 1) as three lane-reductions) --
    ctx = jnp.dot(attn, mem_ref[0], preferred_element_type=jnp.float32)   # [Snl, D]
    nl_emb = nl_emb_ref[0]                                                # [Snl, D]
    wg = wg_ref[...]                                                      # [3, D]
    logit_gen = (jnp.sum(ctx * wg[0:1, :], axis=-1, keepdims=True)
                 + jnp.sum(dec * wg[1:2, :], axis=-1, keepdims=True)
                 + jnp.sum(nl_emb * wg[2:3, :], axis=-1, keepdims=True)
                 + b_gen_ref[...])                                        # [Snl, 1]
    p_gen = 1.0 / (1.0 + jnp.exp(-logit_gen))
    p_copy = 1.0 - p_gen

    # ---- copy distribution over simple names --------------------------------
    p_copy_ast = jnp.dot(attn, nl_conv_ref[0],
                         preferred_element_type=jnp.float32)      # [Snl, Mname]
    p_copy_ast = jnp.where(p_copy_ast == 0.0, EPS, p_copy_ast)
    mc = jnp.max(p_copy_ast, axis=-1, keepdims=True)
    ec = jnp.exp(p_copy_ast - mc)
    p_copy_sm = ec * pl.reciprocal(jnp.sum(ec, axis=-1, keepdims=True), approx=True)

    # ---- combine, clamp, log ------------------------------------------------
    p = jnp.concatenate([p_vocab * p_gen, p_copy_sm * p_copy], axis=-1)
    p = jnp.clip(p, EPS, 1.0)
    out_ref[0] = jnp.log(p)


def pointer_generator_forward(params, decoder_output, decoder_attn, memory,
                              nl_embed, nl_convert, semantic_mask):
    """Fused PointerGenerator forward. Returns log-probs [B, nl_len, nl_vocab]."""
    b, snl, d = decoder_output.shape
    h = decoder_attn.shape[1]
    sast = memory.shape[1]
    mname = nl_convert.shape[2]
    vgen = params["w_vocab"].shape[1]
    vtot = vgen + mname

    # pack the [3D, 1] p_gen weight as (3, D): rows = [ctx | dec | nl] segments
    wg_packed = params["w_gen"][:, 0].reshape(3, d).astype(jnp.float32)
    b_gen = params["b_gen"].reshape(1, 1).astype(jnp.float32)
    b_vocab = params["b_vocab"].reshape(1, vgen).astype(jnp.float32)
    sem = semantic_mask.reshape(b, 1, sast).astype(jnp.int32)

    return pl.pallas_call(
        _pointer_generator_kernel,
        grid=(b,),
        in_specs=[
            pl.BlockSpec((1, snl, d), lambda i: (i, 0, 0)),           # decoder_output
            pl.BlockSpec((1, h, snl, sast), lambda i: (i, 0, 0, 0)),  # decoder_attn
            pl.BlockSpec((1, sast, d), lambda i: (i, 0, 0)),          # memory
            pl.BlockSpec((1, snl, d), lambda i: (i, 0, 0)),           # nl_embed
            pl.BlockSpec((1, sast, mname), lambda i: (i, 0, 0)),      # nl_convert
            pl.BlockSpec((1, 1, sast), lambda i: (i, 0, 0)),          # semantic_mask
            pl.BlockSpec((d, vgen), lambda i: (0, 0)),                # w_vocab
            pl.BlockSpec((1, vgen), lambda i: (0, 0)),                # b_vocab
            pl.BlockSpec((3, d), lambda i: (0, 0)),                   # wg_packed
            pl.BlockSpec((1, 1), lambda i: (0, 0)),                   # b_gen
        ],
        out_specs=pl.BlockSpec((1, snl, vtot), lambda i: (i, 0, 0)),
        out_shape=jax.ShapeDtypeStruct((b, snl, vtot), jnp.float32),
        compiler_params=pltpu.CompilerParams(dimension_semantics=("parallel",)),
    )(decoder_output.astype(jnp.float32), decoder_attn.astype(jnp.float32),
      memory.astype(jnp.float32), nl_embed.astype(jnp.float32),
      nl_convert.astype(jnp.float32), sem,
      params["w_vocab"].astype(jnp.float32), b_vocab,
      wg_packed, b_gen)


# ------------------------- pure-JAX reference --------------------------------
def pointer_generator_reference(p, decoder_output, decoder_attn, memory,
                                nl_embed, nl_convert, semantic_mask):
    attn = jnp.sum(decoder_attn, axis=1)
    attn = jnp.where(semantic_mask[:, None, :] == 0, 0.0, attn)
    p_vocab = jax.nn.softmax(decoder_output @ p["w_vocab"] + p["b_vocab"], axis=-1)
    ctx = attn @ memory
    total = jnp.concatenate([ctx, decoder_output, nl_embed], axis=-1)
    p_gen = jax.nn.sigmoid(total @ p["w_gen"] + p["b_gen"])
    p_copy = 1.0 - p_gen
    pca = attn @ nl_convert
    pca = jnp.where(pca == 0.0, EPS, pca)
    pca = jax.nn.softmax(pca, axis=-1)
    out = jnp.concatenate([p_vocab * p_gen, pca * p_copy], axis=-1)
    out = jnp.clip(out, EPS, 1.0)
    return jnp.log(out)


# ----------------------------- params ---------------------------------------
def init_params(key):
    k1, k2, k3, k4 = jax.random.split(key, 4)
    return {
        "w_vocab": jax.random.normal(k1, (D_MODEL, V_GEN), jnp.float32)
                   / math.sqrt(D_MODEL),
        "b_vocab": jax.random.normal(k2, (V_GEN,), jnp.float32) * 0.01,
        "w_gen": jax.random.normal(k3, (3 * D_MODEL, 1), jnp.float32)
                 / math.sqrt(3 * D_MODEL),
        "b_gen": jax.random.normal(k4, (1,), jnp.float32) * 0.01,
    }


# ------------------------------ main -----------------------------------------
if __name__ == "__main__":
    root = jax.random.PRNGKey(0)
    kp, kd, ka, km, kn, kc, ks = jax.random.split(root, 7)

    params = init_params(kp)

    decoder_output = jax.random.normal(kd, (B, S_NL, D_MODEL), jnp.float32)
    decoder_attn = jax.nn.softmax(
        jax.random.normal(ka, (B, NUM_HEADS, S_NL, S_AST), jnp.float32), axis=-1)
    memory = jax.random.normal(km, (B, S_AST, D_MODEL), jnp.float32)
    nl_embed = jax.random.normal(kn, (B, S_NL, D_MODEL), jnp.float32)

    # semantic positions (1 == semantic token, 0 == masked out of the copy path)
    semantic_mask = (jax.random.uniform(ks, (B, S_AST)) > 0.3).astype(jnp.int32)
    # ast-position -> simple-name mapping (one-hot rows, zero on non-semantic tokens)
    name_idx = jax.random.randint(kc, (B, S_AST), 0, MAX_SIMPLE_NAME_LEN)
    nl_convert = jax.nn.one_hot(name_idx, MAX_SIMPLE_NAME_LEN, dtype=jnp.float32)
    nl_convert = nl_convert * semantic_mask[:, :, None].astype(jnp.float32)

    fwd = jax.jit(pointer_generator_forward)
    out = fwd(params, decoder_output, decoder_attn, memory,
              nl_embed, nl_convert, semantic_mask)
    jax.block_until_ready(out)

    ref = pointer_generator_reference(params, decoder_output, decoder_attn, memory,
                                      nl_embed, nl_convert, semantic_mask)

    assert out.shape == (B, S_NL, NL_VOCAB)
    assert bool(jnp.all(jnp.isfinite(out)))
    max_err = float(jnp.max(jnp.abs(out - ref)))
    assert max_err < 5e-2, f"kernel vs reference max abs diff = {max_err}"
    print("KERNEL_OK")
</pallas_src>

<mosaic_0001>
module attributes {stable_mosaic.version = 11 : i64} {
  func.func @_pointer_generator_kernel(%arg0: i32, %arg1: memref<1x8x48xf32, #tpu.memory_space<vmem>>, %arg2: memref<1x6x8x16xf32, #tpu.memory_space<vmem>>, %arg3: memref<1x16x48xf32, #tpu.memory_space<vmem>>, %arg4: memref<1x8x48xf32, #tpu.memory_space<vmem>>, %arg5: memref<1x16x10xf32, #tpu.memory_space<vmem>>, %arg6: memref<1x1x16xi32, #tpu.memory_space<vmem>>, %arg7: memref<48x30xf32, #tpu.memory_space<vmem>>, %arg8: memref<1x30xf32, #tpu.memory_space<vmem>>, %arg9: memref<3x48xf32, #tpu.memory_space<vmem>>, %arg10: memref<1x1xf32, #tpu.memory_space<vmem>>, %arg11: memref<1x8x40xf32, #tpu.memory_space<vmem>>) attributes {dimension_semantics = [#tpu.dimension_semantics<parallel>], iteration_bounds = array<i64: 2>, scalar_prefetch = 0 : i64, scratch_operands = 0 : i64, tpu.core_type = #tpu.core_type<tc>, window_params = [{transform_indices = @transform_0, window_bounds = array<i64: 1, 8, 48>}, {transform_indices = @transform_1, window_bounds = array<i64: 1, 6, 8, 16>}, {transform_indices = @transform_2, window_bounds = array<i64: 1, 16, 48>}, {transform_indices = @transform_3, window_bounds = array<i64: 1, 8, 48>}, {transform_indices = @transform_4, window_bounds = array<i64: 1, 16, 10>}, {transform_indices = @transform_5, window_bounds = array<i64: 1, 1, 16>}, {pipeline_mode = #tpu.pipeline_mode<synchronous>, transform_indices = @transform_6, window_bounds = array<i64: 48, 30>}, {pipeline_mode = #tpu.pipeline_mode<synchronous>, transform_indices = @transform_7, window_bounds = array<i64: 1, 30>}, {pipeline_mode = #tpu.pipeline_mode<synchronous>, transform_indices = @transform_8, window_bounds = array<i64: 3, 48>}, {pipeline_mode = #tpu.pipeline_mode<synchronous>, transform_indices = @transform_9, window_bounds = array<i64: 1, 1>}, {transform_indices = @transform_10, window_bounds = array<i64: 1, 8, 40>}]} {
    %c0 = arith.constant 0 : index
    %c0_0 = arith.constant 0 : index
    %c0_1 = arith.constant 0 : index
    %c0_2 = arith.constant 0 : index
    %0 = vector.load %arg2[%c0, %c0_0, %c0_1, %c0_2] : memref<1x6x8x16xf32, #tpu.memory_space<vmem>>, vector<1x6x8x16xf32>
    %1 = vector.shape_cast %0 : vector<1x6x8x16xf32> to vector<6x8x16xf32>
    %cst = arith.constant dense<0.000000e+00> : vector<8x16xf32>
    %2 = vector.multi_reduction <add>, %1, %cst [0] : vector<6x8x16xf32> to vector<8x16xf32>
    %c0_3 = arith.constant 0 : index
    %c0_4 = arith.constant 0 : index
    %c0_5 = arith.constant 0 : index
    %3 = vector.load %arg6[%c0_3, %c0_4, %c0_5] : memref<1x1x16xi32, #tpu.memory_space<vmem>>, vector<1x1x16xi32>
    %4 = vector.shape_cast %3 : vector<1x1x16xi32> to vector<1x16xi32>
    %c0_i32 = arith.constant 0 : i32
    %5 = vector.broadcast %c0_i32 : i32 to vector<1x16xi32>
    %6 = arith.cmpi eq, %4, %5 : vector<1x16xi32>
    %cst_6 = arith.constant 0.000000e+00 : f32
    %7 = vector.shape_cast %6 : vector<1x16xi1> to vector<1x16xi1>
    %8 = vector.broadcast %7 : vector<1x16xi1> to vector<8x16xi1>
    %9 = vector.broadcast %cst_6 : f32 to vector<8x16xf32>
    %10 = arith.select %8, %9, %2 : vector<8x16xi1>, vector<8x16xf32>
    %c0_7 = arith.constant 0 : index
    %c0_8 = arith.constant 0 : index
    %c0_9 = arith.constant 0 : index
    %11 = vector.load %arg1[%c0_7, %c0_8, %c0_9] : memref<1x8x48xf32, #tpu.memory_space<vmem>>, vector<1x8x48xf32>
    %12 = vector.shape_cast %11 : vector<1x8x48xf32> to vector<8x48xf32>
    %c0_10 = arith.constant 0 : index
    %c0_11 = arith.constant 0 : index
    %13 = vector.load %arg7[%c0_10, %c0_11] : memref<48x30xf32, #tpu.memory_space<vmem>>, vector<48x30xf32>
    %cst_12 = arith.constant dense<0.000000e+00> : vector<8x30xf32>
    %14 = tpu.matmul %12, %13, %cst_12 {dimension_numbers = #tpu.dot_dimension_numbers<[1], [0], [0], [1], [0, 0, 1, 1], [], []>} : vector<8x48xf32>, vector<48x30xf32>, vector<8x30xf32> -> vector<8x30xf32>
    %c0_13 = arith.constant 0 : index
    %c0_14 = arith.constant 0 : index
    %15 = vector.load %arg8[%c0_13, %c0_14] : memref<1x30xf32, #tpu.memory_space<vmem>>, vector<1x30xf32>
    %16 = vector.broadcast %15 : vector<1x30xf32> to vector<8x30xf32>
    %17 = arith.addf %14, %16 : vector<8x30xf32>
    %cst_15 = arith.constant dense<0xFF800000> : vector<8xf32>
    %18 = vector.multi_reduction <maximumf>, %17, %cst_15 [1] : vector<8x30xf32> to vector<8xf32>
    %19 = vector.shape_cast %18 : vector<8xf32> to vector<8x1xf32>
    %20 = vector.broadcast %19 : vector<8x1xf32> to vector<8x30xf32>
    %21 = arith.subf %17, %20 : vector<8x30xf32>
    %22 = math.exp %21 : vector<8x30xf32>
    %cst_16 = arith.constant dense<0.000000e+00> : vector<8xf32>
    %23 = vector.multi_reduction <add>, %22, %cst_16 [1] : vector<8x30xf32> to vector<8xf32>
    %24 = vector.shape_cast %23 : vector<8xf32> to vector<8x1xf32>
    %25 = tpu.reciprocal %24 {approx = true} : vector<8x1xf32> -> vector<8x1xf32>
    %26 = vector.broadcast %25 : vector<8x1xf32> to vector<8x30xf32>
    %27 = arith.mulf %22, %26 : vector<8x30xf32>
    %c0_17 = arith.constant 0 : index
    %c0_18 = arith.constant 0 : index
    %c0_19 = arith.constant 0 : index
    %28 = vector.load %arg3[%c0_17, %c0_18, %c0_19] : memref<1x16x48xf32, #tpu.memory_space<vmem>>, vector<1x16x48xf32>
    %29 = vector.shape_cast %28 : vector<1x16x48xf32> to vector<16x48xf32>
    %cst_20 = arith.constant dense<0.000000e+00> : vector<8x48xf32>
    %30 = tpu.matmul %10, %29, %cst_20 {dimension_numbers = #tpu.dot_dimension_numbers<[1], [0], [0], [1], [0, 0, 1, 1], [], []>} : vector<8x16xf32>, vector<16x48xf32>, vector<8x48xf32> -> vector<8x48xf32>
    %c0_21 = arith.constant 0 : index
    %c0_22 = arith.constant 0 : index
    %c0_23 = arith.constant 0 : index
    %31 = vector.load %arg4[%c0_21, %c0_22, %c0_23] : memref<1x8x48xf32, #tpu.memory_space<vmem>>, vector<1x8x48xf32>
    %32 = vector.shape_cast %31 : vector<1x8x48xf32> to vector<8x48xf32>
    %c0_24 = arith.constant 0 : index
    %c0_25 = arith.constant 0 : index
    %33 = vector.load %arg9[%c0_24, %c0_25] : memref<3x48xf32, #tpu.memory_space<vmem>>, vector<3x48xf32>
    %34 = vector.extract_strided_slice %33 {offsets = [0, 0], sizes = [1, 48], strides = [1, 1]} : vector<3x48xf32> to vector<1x48xf32>
    %35 = vector.broadcast %34 : vector<1x48xf32> to vector<8x48xf32>
    %36 = arith.mulf %30, %35 : vector<8x48xf32>
    %cst_26 = arith.constant dense<0.000000e+00> : vector<8xf32>
    %37 = vector.multi_reduction <add>, %36, %cst_26 [1] : vector<8x48xf32> to vector<8xf32>
    %38 = vector.shape_cast %37 : vector<8xf32> to vector<8x1xf32>
    %39 = vector.extract_strided_slice %33 {offsets = [1, 0], sizes = [1, 48], strides = [1, 1]} : vector<3x48xf32> to vector<1x48xf32>
    %40 = vector.broadcast %39 : vector<1x48xf32> to vector<8x48xf32>
    %41 = arith.mulf %12, %40 : vector<8x48xf32>
    %cst_27 = arith.constant dense<0.000000e+00> : vector<8xf32>
    %42 = vector.multi_reduction <add>, %41, %cst_27 [1] : vector<8x48xf32> to vector<8xf32>
    %43 = vector.shape_cast %42 : vector<8xf32> to vector<8x1xf32>
    %44 = arith.addf %38, %43 : vector<8x1xf32>
    %45 = vector.extract_strided_slice %33 {offsets = [2, 0], sizes = [1, 48], strides = [1, 1]} : vector<3x48xf32> to vector<1x48xf32>
    %46 = vector.broadcast %45 : vector<1x48xf32> to vector<8x48xf32>
    %47 = arith.mulf %32, %46 : vector<8x48xf32>
    %cst_28 = arith.constant dense<0.000000e+00> : vector<8xf32>
    %48 = vector.multi_reduction <add>, %47, %cst_28 [1] : vector<8x48xf32> to vector<8xf32>
    %49 = vector.shape_cast %48 : vector<8xf32> to vector<8x1xf32>
    %50 = arith.addf %44, %49 : vector<8x1xf32>
    %c0_29 = arith.constant 0 : index
    %c0_30 = arith.constant 0 : index
    %51 = vector.load %arg10[%c0_29, %c0_30] : memref<1x1xf32, #tpu.memory_space<vmem>>, vector<1x1xf32>
    %52 = vector.broadcast %51 : vector<1x1xf32> to vector<8x1xf32>
    %53 = arith.addf %50, %52 : vector<8x1xf32>
    %cst_31 = arith.constant 0.000000e+00 : f32
    %54 = vector.broadcast %cst_31 : f32 to vector<8x1xf32>
    %55 = arith.subf %54, %53 : vector<8x1xf32>
    %56 = math.exp %55 : vector<8x1xf32>
    %cst_32 = arith.constant 1.000000e+00 : f32
    %57 = vector.broadcast %cst_32 : f32 to vector<8x1xf32>
    %58 = arith.addf %57, %56 : vector<8x1xf32>
    %cst_33 = arith.constant 1.000000e+00 : f32
    %59 = vector.broadcast %cst_33 : f32 to vector<8x1xf32>
    %60 = arith.divf %59, %58 : vector<8x1xf32>
    %cst_34 = arith.constant 1.000000e+00 : f32
    %61 = vector.broadcast %cst_34 : f32 to vector<8x1xf32>
    %62 = arith.subf %61, %60 : vector<8x1xf32>
    %c0_35 = arith.constant 0 : index
    %c0_36 = arith.constant 0 : index
    %c0_37 = arith.constant 0 : index
    %63 = vector.load %arg5[%c0_35, %c0_36, %c0_37] : memref<1x16x10xf32, #tpu.memory_space<vmem>>, vector<1x16x10xf32>
    %64 = vector.shape_cast %63 : vector<1x16x10xf32> to vector<16x10xf32>
    %cst_38 = arith.constant dense<0.000000e+00> : vector<8x10xf32>
    %65 = tpu.matmul %10, %64, %cst_38 {dimension_numbers = #tpu.dot_dimension_numbers<[1], [0], [0], [1], [0, 0, 1, 1], [], []>} : vector<8x16xf32>, vector<16x10xf32>, vector<8x10xf32> -> vector<8x10xf32>
    %cst_39 = arith.constant 0.000000e+00 : f32
    %66 = vector.broadcast %cst_39 : f32 to vector<8x10xf32>
    %67 = arith.cmpf oeq, %65, %66 : vector<8x10xf32>
    %cst_40 = arith.constant 9.99999971E-10 : f32
    %68 = vector.broadcast %cst_40 : f32 to vector<8x10xf32>
    %69 = arith.select %67, %68, %65 : vector<8x10xi1>, vector<8x10xf32>
    %cst_41 = arith.constant dense<0xFF800000> : vector<8xf32>
    %70 = vector.multi_reduction <maximumf>, %69, %cst_41 [1] : vector<8x10xf32> to vector<8xf32>
    %71 = vector.shape_cast %70 : vector<8xf32> to vector<8x1xf32>
    %72 = vector.broadcast %71 : vector<8x1xf32> to vector<8x10xf32>
    %73 = arith.subf %69, %72 : vector<8x10xf32>
    %74 = math.exp %73 : vector<8x10xf32>
    %cst_42 = arith.constant dense<0.000000e+00> : vector<8xf32>
    %75 = vector.multi_reduction <add>, %74, %cst_42 [1] : vector<8x10xf32> to vector<8xf32>
    %76 = vector.shape_cast %75 : vector<8xf32> to vector<8x1xf32>
    %77 = tpu.reciprocal %76 {approx = true} : vector<8x1xf32> -> vector<8x1xf32>
    %78 = vector.broadcast %77 : vector<8x1xf32> to vector<8x10xf32>
    %79 = arith.mulf %74, %78 : vector<8x10xf32>
    %80 = vector.broadcast %60 : vector<8x1xf32> to vector<8x30xf32>
    %81 = arith.mulf %27, %80 : vector<8x30xf32>
    %82 = vector.broadcast %62 : vector<8x1xf32> to vector<8x10xf32>
    %83 = arith.mulf %79, %82 : vector<8x10xf32>
    %84 = tpu.concatenate %81, %83 in 1 : vector<8x30xf32>, vector<8x10xf32> -> vector<8x40xf32>
    %cst_43 = arith.constant 9.99999971E-10 : f32
    %cst_44 = arith.constant 1.000000e+00 : f32
    %85 = vector.broadcast %cst_43 : f32 to vector<8x40xf32>
    %86 = arith.maximumf %85, %84 : vector<8x40xf32>
    %87 = vector.broadcast %cst_44 : f32 to vector<8x40xf32>
    %88 = arith.minimumf %87, %86 : vector<8x40xf32>
    %89 = math.log %88 : vector<8x40xf32>
    %c0_45 = arith.constant 0 : index
    %c0_46 = arith.constant 0 : index
    %c0_47 = arith.constant 0 : index
    %90 = vector.load %arg11[%c0_45, %c0_46, %c0_47] : memref<1x8x40xf32, #tpu.memory_space<vmem>>, vector<1x8x40xf32>
    %91 = vector.shape_cast %90 : vector<1x8x40xf32> to vector<8x40xf32>
    %92 = vector.shape_cast %89 : vector<8x40xf32> to vector<1x8x40xf32>
    tpu.vector_store %arg11[%c0_45, %c0_46, %c0_47], %92 {strides = array<i32>} : memref<1x8x40xf32, #tpu.memory_space<vmem>>, vector<1x8x40xf32>,
    return
  }
  func.func @transform_0(%arg0: i32) -> (i32, i32, i32) {
    %c0_i32 = arith.constant 0 : i32
    %c0_i32_0 = arith.constant 0 : i32
    %c0_i32_1 = arith.constant 0 : i32
    return %arg0, %c0_i32, %c0_i32_0 : i32, i32, i32
  }
  func.func @transform_1(%arg0: i32) -> (i32, i32, i32, i32) {
    %c0_i32 = arith.constant 0 : i32
    %c0_i32_0 = arith.constant 0 : i32
    %c0_i32_1 = arith.constant 0 : i32
    %c0_i32_2 = arith.constant 0 : i32
    return %arg0, %c0_i32, %c0_i32_0, %c0_i32_1 : i32, i32, i32, i32
  }
  func.func @transform_2(%arg0: i32) -> (i32, i32, i32) {
    %c0_i32 = arith.constant 0 : i32
    %c0_i32_0 = arith.constant 0 : i32
    %c0_i32_1 = arith.constant 0 : i32
    return %arg0, %c0_i32, %c0_i32_0 : i32, i32, i32
  }
  func.func @transform_3(%arg0: i32) -> (i32, i32, i32) {
    %c0_i32 = arith.constant 0 : i32
    %c0_i32_0 = arith.constant 0 : i32
    %c0_i32_1 = arith.constant 0 : i32
    return %arg0, %c0_i32, %c0_i32_0 : i32, i32, i32
  }
  func.func @transform_4(%arg0: i32) -> (i32, i32, i32) {
    %c0_i32 = arith.constant 0 : i32
    %c0_i32_0 = arith.constant 0 : i32
    %c0_i32_1 = arith.constant 0 : i32
    return %arg0, %c0_i32, %c0_i32_0 : i32, i32, i32
  }
  func.func @transform_5(%arg0: i32) -> (i32, i32, i32) {
    %c0_i32 = arith.constant 0 : i32
    %c0_i32_0 = arith.constant 0 : i32
    %c0_i32_1 = arith.constant 0 : i32
    return %arg0, %c0_i32, %c0_i32_0 : i32, i32, i32
  }
  func.func @transform_6(%arg0: i32) -> (i32, i32) {
    %c0_i32 = arith.constant 0 : i32
    %c0_i32_0 = arith.constant 0 : i32
    %c0_i32_1 = arith.constant 0 : i32
    return %c0_i32, %c0_i32_0 : i32, i32
  }
  func.func @transform_7(%arg0: i32) -> (i32, i32) {
    %c0_i32 = arith.constant 0 : i32
    %c0_i32_0 = arith.constant 0 : i32
    %c0_i32_1 = arith.constant 0 : i32
    return %c0_i32, %c0_i32_0 : i32, i32
  }
  func.func @transform_8(%arg0: i32) -> (i32, i32) {
    %c0_i32 = arith.constant 0 : i32
    %c0_i32_0 = arith.constant 0 : i32
    %c0_i32_1 = arith.constant 0 : i32
    return %c0_i32, %c0_i32_0 : i32, i32
  }
  func.func @transform_9(%arg0: i32) -> (i32, i32) {
    %c0_i32 = arith.constant 0 : i32
    %c0_i32_0 = arith.constant 0 : i32
    %c0_i32_1 = arith.constant 0 : i32
    return %c0_i32, %c0_i32_0 : i32, i32
  }
  func.func @transform_10(%arg0: i32) -> (i32, i32, i32) {
    %c0_i32 = arith.constant 0 : i32
    %c0_i32_0 = arith.constant 0 : i32
    %c0_i32_1 = arith.constant 0 : i32
    return %arg0, %c0_i32, %c0_i32_0 : i32, i32, i32
  }
}

</mosaic_0001>

<bundles_post_ra>
// kernel: squeeze.1
= control target key start
LH: loop header
LB: loop body
LE: loop exit
PB: predicated region body
PF: predicated region fallthrough
CT: control target
= control target key end

     0   :  { %vm18_vm0 = vcmask 785408   ;;  %s37_s8 = smov 80   ;;  %vm7_vm1 = vcmask 392192   ;;  %vm22_vm2 = vcmask 261120   ;;  %vm25_vm3 = vcmask 392448   ;;  %s54_s0 = inlined_call_operand.vmem [shape: f32[144], index: 0, kind: input, shape index: {}]   ;;  %s55_s1 = inlined_call_operand.vmem [shape: f32[3,48], index: 1, kind: output, shape index: {}]  }
   0x1   :  { %v4_v0 = vld [vmem:[%s54_s0] sm:$0x3]  ;;  %s36_s0 = smov 32  }
   0x2   :  { %5 = vst [vmem:[#allocation1] sm:$0x3] %v4_v0 }
   0x9   :  { %v15_v1 = vld [vmem:[#allocation1] sm:$0x1]   ;;  %v17_v2 = vld [vmem:[#allocation1 + $0x1] sm:$0x1]  }
   0xa   :  { %v19_v3 = vsel %vm18_vm0, %v17_v2, %v15_v1  ;;  %v9_v4 = vld [vmem:[#allocation1] sm:$0x1]  }
   0xb   :  { %20 = vrot.lane.b32.xlu0 %v19_v3, %s36_s0  ;;  %v6_v5 = vld [vmem:[#allocation1] sm:$0x1]  }
   0xc   :  { %8 = vst.msk [vmem:[#allocation0] sm:$0x1] %vm7_vm1, %v6_v5  }
  0x13   :  { %10 = vrot.lane.b32.xlu0 %v9_v4, %s37_s8 }
  0x7d   :  { %v21_v6 = vpop.permute.xlu0 %20  }
  0x7e   :  { %24 = vst.msk [vmem:[#allocation0 + $0x2] sm:$0x1] %vm22_vm2, %v21_v6  }
  0x7f   :  { %27 = vst.msk [vmem:[#allocation0 + $0x2] sm:$0x1] %vm25_vm3, %v21_v6  }
  0x85   :  { %v11_v7 = vpop.permute.xlu0 %10  }
  0x86   :  { %14 = vst.msk [vmem:[#allocation0 + $0x1] sm:$0x1] %vm7_vm1, %v11_v7  }
  0x8d   :  { %v30_v8 = vld [vmem:[#allocation0] sm:$0xf] }
  0x8e   :  { %33 = vst [vmem:[%s55_s1] sm:$0xf] %v30_v8 }

// kernel: pointer_generator_forward.1
= control target key start
LH: loop header
LB: loop body
LE: loop exit
PB: predicated region body
PF: predicated region fallthrough
CT: control target
= control target key end

     0   :  { %s1447_s0 = inlined_call_operand.hbm [shape: f32[2,8,48], index: 0, kind: input, shape index: {}]   ;;  %s1448_s1 = inlined_call_operand.vmem [shape: f32[2,6,8,16], index: 1, kind: input, shape index: {}]   ;;  %s1449_s2 = inlined_call_operand.hbm [shape: f32[2,16,48], index: 2, kind: input, shape index: {}]   ;;  %s1450_s3 = inlined_call_operand.hbm [shape: f32[2,8,48], index: 3, kind: input, shape index: {}]   ;;  %s1451_s4 = inlined_call_operand.vmem [shape: f32[2,16,10], index: 4, kind: input, shape index: {}]   ;;  %s1452_s5 = inlined_call_operand.vmem [shape: s32[2,1,16], index: 5, kind: input, shape index: {}]   ;;  %s1453_s6 = inlined_call_operand.vmem [shape: f32[48,30], index: 6, kind: input, shape index: {}]   ;;  %s1454_s7 = inlined_call_operand.vmem [shape: f32[1,30], index: 7, kind: input, shape index: {}]   ;;  %s1455_s8 = inlined_call_operand.vmem [shape: f32[3,48], index: 8, kind: input, shape index: {}]   ;;  %s1456_s9 = inlined_call_operand.<no memory space> [shape: f32[1,1], index: 9, kind: input, shape index: {}]   ;;  %s1457_s10 = inlined_call_operand.hbm [shape: f32[2,8,40], index: 10, kind: output, shape index: {}]  }
   0x1   :  { %1467 = sst [smem:[#allocation20_spill]] %s1449_s2  ;;  %v15_v0 = vstv %s1456_s9 }
   0x2   :  { %1468 = sst [smem:[#allocation21_spill]] %s1457_s10  ;;  %16 = vst [vmem:[#allocation2] sm:$0x1] %v15_v0 }
   0x3   :  { %17 = vsyncpa [#allocation4], 0 }
   0x4   :  { %19 = vsyncpa [#allocation4 + $0x1], 0 }
   0x5   :  { %20 = vsyncpa [#allocation7], 0 }
   0x6   :  { %22 = vsyncpa [#allocation7 + $0x1], 0 }
   0x7   :  { %23 = vsyncpa [#allocation5], 0 }
   0x8   :  { %25 = vsyncpa [#allocation5 + $0x1], 0  ;;  %s1202_s15 = smov 0   ;;  %s1204_s16 = smov 0  }
   0x9   :  { %s1206_s17 = smov 0   ;;  %s1208_s18 = smov 0  }
   0xa LB: > { %1469 = sst [smem:[#allocation13_spill]] %s1126_s15  ;;  %s1223_s9 = sadd.s32 4294967295, %s1138_s18   ;;  %s1138_s18 = sphi %s1208_s18, %s1487_s18   ;;  %s1134_s17 = sphi %s1206_s17, %s1489_s17   ;;  %s1130_s16 = sphi %s1204_s16, %s1491_s16   ;;  %s1126_s15 = sphi %s1202_s15, %s1490_s15  }
   0xb   : > { %1470 = sst [smem:[#allocation14_spill]] %s1134_s17  ;;  %s872_s19 = sadd.s32 4294967294, %s1138_s18  }
   0xc   : > { %1471 = sst [smem:[#allocation15_spill]] %s1138_s18  ;;  %s1227_s20 = sadd.s32 1, %s1138_s18  }
   0xd   : > { %1472 = sst [smem:[#allocation16_spill]] %s1227_s20  ;;  %s38_s21 = sadd.s32 1, %s1134_s17 }
   0xe   : > { %s35_s22 = ssub.s32 %s1138_s18, %s1227_s20  ;;  %p45_p0 = scmp.ne.s32.totalorder %s1134_s17, %s1130_s16 }
   0xf   : > { %p36_p1 = scmp.eq.s32.totalorder %s35_s22, 0  ;;  %p46_p2 = scmp.eq.s32.totalorder %s1138_s18, 0 }
  0x10   : > { %p51_p3 = scmp.ne.s32.totalorder %s1130_s16, %s1126_s15  ;;  %p52_p4 = scmp.eq.s32.totalorder %s1223_s9, 0 }
  0x11   : > { %s1239_s23 = scalar_select %p36_p1, %s1134_s17, %s38_s21  }
  0x12   : > { %p47_p5 = por %p46_p2, %p45_p0  ;;  %p1241_p6 = por %p52_p4, %p51_p3 }
  0x13   : > { %1473 = sst [smem:[#allocation17_spill]] %s1239_s23  ;;  %p289_p7 = scmp.eq.s32.totalorder %s1223_s9, 1 }
  0x14   : > { %p295_p8 = scmp.eq.s32.totalorder %s872_s19, 1  ;;  %p874_p9 = scmp.ge.s32.totalorder %s1138_s18, 2 }
  0x15   : > { %p922_p10 = scmp.lt.s32.totalorder %s1138_s18, 2  ;;  %p1248_p11 = por %p289_p7, %p45_p0 }
  0x16   : > { %p1252_p12 = por %p295_p8, %p51_p3  ;;  %s1257_s27 = sand.u32 1, %s1134_s17  }
  0x17   : > { %s1475_s25 = scalar_select %p1248_p11, 1, 0 }
  0x18   : > { %s1477_s26 = scalar_select %p1252_p12, 1, 0 }
  0x19   : > { %1476 = sst [smem:[#allocation18_spill]] %s1475_s25  ;;  %p1259_p13 = pnand %p922_p10, %p47_p5 }
  0x1a   : > { %1478 = sst [smem:[#allocation19_spill]] %s1477_s26  ;;  %s354_s29 = sand.u32 1, %s1138_s18  }
  0x1b   : > { %s877_s30 = sshll.u32 %s1257_s27, 4  ;;  %s897_s11 = sshll.u32 %s1138_s18, 4 }
  0x1c   : > { %s1480_s2 = sld [smem:[#allocation20_spill]]  ;;  %s358_s19 = scalar_lea.vmem [#allocation6], %s877_s30 }
  0x1d   : > { %s366_s21 = sshll.u32 %s358_s19, 4  ;;  %p882_p0 = scmp.ge.s32.totalorder %s1138_s18, 1  ;;  %s367_s21 = int_to_ptr.vmem [resolvable:$true] %s366_s21 }
  0x1e   : > { %s1270_s23 = scalar_lea.sflag [#allocation7], %s354_s29  ;;  %p982_p2 = pneg %p1259_p13 }
  0x22   : > { %s363_s14 = scalar_lea.hbm %s1480_s2, %s897_s11  ;;  %s985_s30 = scalar_lea.hbm %s1480_s2, 32 }
  0x23   : > { %s364_s22 = sshll.u32 %s363_s14, 4  ;;  %s365_s22 = int_to_ptr.hbm [resolvable:$true] %s364_s22 }
  0x24   : > { %s978_s17 = sshra.s32 %s365_s22, 4  ;;  %s979_s17 = int_to_ptr.hbm [resolvable:$true] %s978_s17 }
  0x25   : > { %s980_s20 = scalar_lea.hbm %s979_s17, 16  ;;  %p986_p5 = scmp.lt.s32.totalorder %s979_s17, %s1480_s2 }
  0x26   : > { %p981_p1 = scmp.ne.s32.totalorder %s979_s17, %s980_s20  ;;  %p987_p7 = scmp.lt.s32.totalorder %s985_s30, %s980_s20 }
  0x28   : > { %p983_p3 = pnand %p982_p2, %p981_p1  ;;  %p988_p8 = por %p987_p7, %p986_p5 }
  0x2a   : > { %p984_p4 = pneg %p983_p3 }
  0x2c   : > { %p989_p10 = pnand %p988_p8, %p984_p4 }
  0x2e   : > { %992 = shalt.err (!%p989_p10)
}
  0x2f   : > { %s1140_s29 = smov 128   ;;  %s1141_s19 = smov 8  }
  0x30   : > { %914 = dma.hbm_to_vmem [thread:$0]  (!%p1259_p13), %s365_s22, 256, %s367_s21, %s1270_s23, %s1140_s29, %s1140_s29, %s1141_s19  }
  0x31   : > { %p407_p1 = scmp.lt.s32.totalorder %s1138_s18, 3  ;;  %s875_s12 = sshll.u32 %s1257_s27, 3 }
  0x32   : > { %s876_s11 = sshll.u32 %s1138_s18, 3  ;;  %s331_s14 = scalar_lea.vmem [#allocation3], %s875_s12 }
  0x33   : > { %p1291_p3 = pnand %p882_p0, %p407_p1  ;;  %s335_s13 = scalar_lea.hbm %s1447_s0, %s876_s11 }
  0x34   : > { %s339_s2 = sshll.u32 %s331_s14, 4  ;;  %s337_s26 = sshll.u32 %s335_s13, 4  ;;  %s340_s2 = int_to_ptr.vmem [resolvable:$true] %s339_s2  ;;  %s338_s26 = int_to_ptr.hbm [resolvable:$true] %s337_s26 }
  0x35   : > { %s328_s15 = scalar_lea.sflag [#allocation4], %s1257_s27  ;;  %s1008_s21 = sshra.s32 %s338_s26, 4  ;;  %s1009_s21 = int_to_ptr.hbm [resolvable:$true] %s1008_s21 }
  0x36   : > { %s1010_s22 = scalar_lea.hbm %s1009_s21, 8  ;;  %s1015_s18 = scalar_lea.hbm %s1447_s0, 16 }
  0x37   : > { %p1011_p4 = scmp.ne.s32.totalorder %s1009_s21, %s1010_s22  ;;  %p1016_p7 = scmp.lt.s32.totalorder %s1009_s21, %s1447_s0 }
  0x38   : > { %p1017_p8 = scmp.lt.s32.totalorder %s1015_s18, %s1010_s22 }
  0x39   : > { %p1013_p0 = pnand %p1011_p4, %p982_p2 }
  0x3a   : > { %p1018_p10 = por %p1017_p8, %p1016_p7 }
  0x3b   : > { %p1014_p5 = pneg %p1013_p0 }
  0x3d   : > { %p1019_p1 = pnand %p1018_p10, %p1014_p5 }
  0x3f   : > { %1022 = shalt.err (!%p1019_p1)
}
  0x40   : > { %911 = dma.hbm_to_vmem [thread:$0]  (!%p1259_p13), %s338_s26, 128, %s340_s2, %s328_s15  }
  0x41   : > { %s384_s14 = scalar_lea.hbm %s1450_s3, %s876_s11  ;;  %s380_s25 = scalar_lea.vmem [#allocation8], %s875_s12 }
  0x42   : > { %s388_s10 = sshll.u32 %s380_s25, 4  ;;  %s386_s29 = sshll.u32 %s384_s14, 4  ;;  %s389_s10 = int_to_ptr.vmem [resolvable:$true] %s388_s10  ;;  %s387_s29 = int_to_ptr.hbm [resolvable:$true] %s386_s29 }
  0x43   : > { %s1038_s19 = sshra.s32 %s387_s29, 4  ;;  %s1045_s2 = scalar_lea.hbm %s1450_s3, 16  ;;  %s1039_s19 = int_to_ptr.hbm [resolvable:$true] %s1038_s19 }
  0x44   : > { %s1040_s21 = scalar_lea.hbm %s1039_s19, 8  ;;  %p1046_p7 = scmp.lt.s32.totalorder %s1039_s19, %s1450_s3 }
  0x45   : > { %p1041_p4 = scmp.ne.s32.totalorder %s1039_s19, %s1040_s21  ;;  %p1047_p8 = scmp.lt.s32.totalorder %s1045_s2, %s1040_s21 }
  0x47   : > { %p1043_p0 = pnand %p1041_p4, %p982_p2  ;;  %p1048_p10 = por %p1047_p8, %p1046_p7 }
  0x49   : > { %p1044_p5 = pneg %p1043_p0 }
  0x4b   : > { %p1049_p1 = pnand %p1048_p10, %p1044_p5 }
  0x4d   : > { %1052 = shalt.err (!%p1049_p1)
}
  0x4e   : > { %917 = dma.hbm_to_vmem [thread:$0]  (!%p1259_p13), %s387_s29, 128, %s389_s10, %s1270_s23  }
  0x4f   : > { %411 = sbr.rel (%p1291_p3) target bundleno = 648 (0x288), region = 60  ;;  %s1328_s25 = sand.u32 (!%p1291_p3), 1, %s1130_s16  }
  0x50   : > { %s1331_s12 = sshll.u32 (!%p1291_p3), %s1328_s25, 3  ;;  %s414_s11 = scalar_lea.sflag (!%p1291_p3), [#allocation4], %s1328_s25 }
  0x51   : > { %s417_s20 = scalar_lea.vmem (!%p1291_p3), [#allocation3], %s1331_s12 }
  0x54   : > { %1113 = dma.done.wait (%p1241_p6), %s414_s11, 128  }
  0x55   : > { %1115 = vsyncadd (%p1241_p6), %s414_s11, 4294967168  ;;  %s423_s10 = sand.u32 1, %s1223_s9   ;;  %s884_s23 = sshll.u32 %s1328_s25, 4 }
  0x56   : > { %s424_s28 = scalar_lea.sflag [#allocation7], %s423_s10  ;;  %s427_s17 = scalar_lea.vmem [#allocation6], %s884_s23 }
  0x57   : > { %1117 = dma.done.wait (%p1241_p6), %s424_s28, 384  }
  0x58   : > { %1119 = vsyncadd (%p1241_p6), %s424_s28, 4294966912  ;;  %p498_p13 = scmp.lt.s32.totalorder %s1223_s9, 1  ;;  %v1142_v1 = vmov 0   ;;  %v541_v2 = vld [vmem:[%s1453_s6 + $0x28] sm:$0xff]  ;;  %v540_v3 = vld [vmem:[%s1453_s6 + $0x20] sm:$0xff]  ;;  %vm517_vm0 = vcmask 130048  }
  0x59   : > { %961 = vset.pattern.permute.xlu2 %v1142_v1  ;;  %960 = vset.pattern.permute.xlu0 %v1142_v1  ;;  %v583_v4 = vld [vmem:[%s427_s17 + $0x8] sm:$0xff]  ;;  %v582_v8 = vld [vmem:[%s427_s17] sm:$0xff]  ;;  %vm546_vm2 = vcmask 392192   ;;  %s437_s24 = scalar_lea.vmem [#allocation8], %s1331_s12  ;;  %vm570_vm4 = vcmask 244736   ;;  %vm675_vm5 = vcmask 80896  }
  0x5a   : > { %s1347_s30 = scalar_select %p498_p13, %s1223_s9, 1  ;;  %560 = vmatpush.msra.mxu0 %v541_v2  ;;  %v539_v5 = vld [vmem:[%s1453_s6 + $0x18] sm:$0xff]  ;;  %v538_v6 = vld [vmem:[%s1453_s6 + $0x10] sm:$0xff]  ;;  %601 = vmatpush.msra.mxu1 %v583_v4  ;;  %v537_v15 = vld [vmem:[%s1453_s6 + $0x8] sm:$0xff]  ;;  %vm708_vm11 = vcmask 326656  }
  0x5b   : > { %v536_v22 = vld [vmem:[%s1453_s6] sm:$0xff]  ;;  %s1143_s2 = smov 30   ;;  %s894_s15 = sshll.u32 %s1223_s9, 3 }
  0x5c   : > { %s899_s27 = smul.u32 48, %s1347_s30  ;;  %s898_s13 = sshll.u32 %s1347_s30, 4  ;;  %561 = vmatpush.msra.mxu0 %v540_v3  ;;  %602 = vmatpush.msra.mxu1 %v582_v8  ;;  %v535_v26 = vld [vmem:[%s417_s20] sm:$0xff]  ;;  %v607_v36 = vld [vmem:[%s437_s24] sm:$0xff] }
  0x5d   : > { %s507_s19 = scalar_lea.vmem %s1451_s4, %s898_s13  ;;  %s510_s14 = scalar_lea.vmem %s1452_s5, %s1347_s30  ;;  %v608_v34 = vld [vmem:[%s1455_s8] sm:$0x7] }
  0x5e   : > { %s1363_s26 = scalar_lea.vmem %s1448_s1, %s899_s27  ;;  %v652_v7 = vld [vmem:[%s507_s19 + $0x8] sm:$0xff]  ;;  %v651_v9 = vld [vmem:[%s507_s19] sm:$0xff]  ;;  %562 = vmatpush.msra.mxu0 %v539_v5  ;;  %v620_v35 = vperm.slane %v608_v34, 2  ;;  %v609_v42 = vperm.slane %v608_v34, 0  ;;  %v614_v46 = vperm.slane %v608_v34, 1  ;;  %s1482_s10 = sld [smem:[#allocation21_spill]] }
  0x5f   : > { %667 = vmatpush.msra.mxu2 %v652_v7  ;;  %v511_v10 = vld [vmem:[%s1363_s26] sm:$0xff]  ;;  %v512_v11 = vld [vmem:[%s1363_s26 + $0x8] sm:$0xff]  ;;  %v513_v12 = vld [vmem:[%s1363_s26 + $0x10] sm:$0xff]  ;;  %s497_s27 = scalar_lea.vmem [#allocation9], %s1331_s12  ;;  %s711_s29 = scalar_lea.sflag [#allocation5], %s1328_s25 }
  0x60   : > { %v514_v13 = vld [vmem:[%s1363_s26 + $0x18] sm:$0xff]  ;;  %v518_v14 = vsel %vm517_vm0, %v511_v10, 0.0  ;;  %v519_v16 = vsel %vm517_vm0, %v512_v11, 0.0  ;;  %v521_v17 = vsel %vm517_vm0, %v513_v12, 0.0  ;;  %v515_v18 = vld [vmem:[%s1363_s26 + $0x20] sm:$0xff]  ;;  %563 = vmatpush.msra.mxu0 %v538_v6  ;;  %v516_v23 = vld [vmem:[%s1363_s26 + $0x28] sm:$0xff]  ;;  %v621_v37 = vmul.f32 %v620_v35, %v607_v36 }
  0x61   : > { %668 = vmatpush.msra.mxu2 %v651_v9  ;;  %v520_v19 = vadd.f32 %v519_v16, %v518_v14  ;;  %v529_v20 = vld [vmem:[%s510_s14] sm:$0x1]  ;;  %v523_v21 = vsel %vm517_vm0, %v514_v13, 0.0  ;;  %v525_v27 = vsel %vm517_vm0, %v515_v18, 0.0  ;;  %v527_v30 = vsel %vm517_vm0, %v516_v23, 0.0  ;;  %s723_s13 = sshll.u32 %s497_s27, 4  ;;  %s724_s13 = int_to_ptr.vmem [resolvable:$true] %s723_s13 }
  0x62   : > { %vm530_vm1 = vcmp.eq.s32.totalorder %v529_v20, 0  ;;  %564 = vmatpush.msra.mxu0 %v537_v15  ;;  %v622_v38 = vsel %vm546_vm2, %v621_v37, 0.0  ;;  %v962_v39 = vld [vmem:[%s1454_s7] ss:$0 sm:$0xff]  ;;  %v615_v48 = vmul.f32 %v614_v46, %v535_v26 }
  0x63   : > { %v522_v24 = vadd.f32 %v521_v17, %v520_v19  ;;  %v531_v25 = vsel %vm530_vm1, 1, %v1142_v1  ;;  %623 = vadd.xlane.f32.xlu1 %v622_v38  ;;  %v963_v0 = vld [vmem:[#allocation2] ss:$0 sm:$0xff] }
  0x64   : > { %v532_v28 = vperm.slane %v531_v25, 0  ;;  %565 = vmatpush.msra.mxu0 %v536_v22  ;;  %v616_v52 = vsel %vm546_vm2, %v615_v48, 0.0  ;;  %s721_s28 = scalar_lea.hbm %s1482_s10, %s894_s15  ;;  %s1088_s12 = scalar_lea.hbm %s1482_s10, 16 }
  0x65   : > { %v524_v29 = vadd.f32 %v523_v21, %v522_v24  ;;  %890 = vmatmul.msk.f32.vlgmr.msra.gmra.mxu0 %vm546_vm2, %v535_v26  ;;  %s725_s14 = sshll.u32 %s721_s28, 4  ;;  %s726_s14 = int_to_ptr.hbm [resolvable:$true] %s725_s14 }
  0x66   : > { %vm533_vm3 = vcmp.eq.s32.totalorder %v532_v28, 1  ;;  %s1082_s21 = sshra.s32 %s726_s14, 4  ;;  %s1083_s21 = int_to_ptr.hbm [resolvable:$true] %s1082_s21 }
  0x67   : > { %v526_v31 = vadd.f32 %v525_v27, %v524_v29  ;;  %s1084_s17 = scalar_lea.hbm %s1083_s21, 8  ;;  %p1089_p4 = scmp.lt.s32.totalorder %s1083_s21, %s1482_s10 }
  0x68   : > { %p1085_p6 = scmp.ne.s32.totalorder %s1083_s21, %s1084_s17  ;;  %p1090_p0 = scmp.lt.s32.totalorder %s1088_s12, %s1084_s17 }
  0x69   : > { %v528_v32 = vadd.f32 %v527_v30, %v526_v31 }
  0x6a   : > { %p1086_p2 = pnand %p1085_p6, %p1248_p11  ;;  %p1091_p5 = por %p1090_p0, %p1089_p4 }
  0x6b   : > { %v534_v33 = vsel %vm533_vm3, 0.0, %v528_v32 }
  0x6c   : > { %891 = vmatmul.msk.f32.vlgmr.msra.gmra.mxu1 %vm517_vm0, %v534_v33  ;;  %892 = vmatmul.msk.f32.vlgmr.msra.gmra.mxu2 %vm517_vm0, %v534_v33  ;;  %p1087_p3 = pneg %p1086_p2 }
  0x6e   : > { %p1092_p7 = pnand %p1091_p5, %p1087_p3 }
  0xd6   : > { %v624_v54 = vpop.xlane.xlu1 %623 }
  0xe2   : > { %v567_v40 = vpop.f32.mrf.mxu0 }
  0xe3   : > { %v568_v41 = vadd.f32 %v962_v39, %v567_v40 }
  0xe5   : > { %v571_v43 = vsel %vm570_vm4, %v568_v41, -inf }
  0xe6   : > { %572 = vmax.xlane.f32.xlu2 %v571_v43 }
  0xe9   : > { %v604_v44 = vpop.f32.mrf.mxu1 }
  0xea   : > { %v610_v45 = vmul.f32 %v609_v42, %v604_v44 }
  0xec   : > { %v611_v47 = vsel %vm546_vm2, %v610_v45, 0.0 }
  0xed   : > { %612 = vadd.xlane.f32.xlu0 %v611_v47 }
  0xef   : > { %v670_v49 = vpop.f32.mrf.mxu2 }
  0xf0   : > { %vm673_vm6 = vcmp.eq.f32.partialorder %v670_v49, 0.0 }
  0xf1   : > { %v674_v50 = vsel %vm673_vm6, 1e-09, %v670_v49 }
  0xf2   : > { %v676_v51 = vsel %vm675_vm5, %v674_v50, -inf }
  0xf3   : > { %677 = vmax.xlane.f32.xlu1 %v676_v51 }
  0xf5   : > { %617 = vadd.xlane.f32.xlu0 %v616_v52 }
 0x159   : > { %v573_v53 = vpop.xlane.xlu2 %572 }
 0x15a   : > { %v574_v55 = vsub.f32 %v568_v41, %v573_v53 }
 0x15c   : > { %v575_v56 = vmul.f32 1.442695, %v574_v55 }
 0x15e   : > { %964 = vpow2.f32 %v575_v56 }
 0x160   : > { %v613_v57 = vpop.xlane.xlu0 %612 }
 0x164   : > { %v965_v58 = vpop.eup %964 }
 0x165   : > { %v577_v61 = vsel %vm570_vm4, %v965_v58, 0.0 }
 0x166   : > { %v678_v59 = vpop.xlane.xlu1 %677  ;;  %578 = vadd.xlane.f32.xlu1 %v577_v61 }
 0x167   : > { %v679_v60 = vsub.f32 %v674_v50, %v678_v59 }
 0x168   : > { %v618_v62 = vpop.xlane.xlu0 %617 }
 0x169   : > { %v680_v63 = vmul.f32 1.442695, %v679_v60  ;;  %v619_v1 = vadd.f32 %v618_v62, %v613_v57 }
 0x16b   : > { %966 = vpow2.f32 %v680_v63  ;;  %v625_v2 = vadd.f32 %v624_v54, %v619_v1 }
 0x16d   : > { %v630_v3 = vadd.f32 %v963_v0, %v625_v2 }
 0x16f   : > { %v631_v4 = vsub.f32 0.0, %v630_v3 }
 0x171   : > { %v967_v5 = vpop.eup %966  ;;  %v632_v6 = vmul.f32 1.442695, %v631_v4 }
 0x172   : > { %v682_v7 = vsel %vm675_vm5, %v967_v5, 0.0 }
 0x173   : > { %968 = vpow2.f32 %v632_v6  ;;  %683 = vadd.xlane.f32.xlu2 %v682_v7 }
 0x179   : > { %v969_v8 = vpop.eup %968 }
 0x17a   : > { %v634_v9 = vadd.f32 1.0, %v969_v8 }
 0x17c   : > { %970 = vrcp.f32 %v634_v9  ;;  %v646_v13 = vand.u32 2147483648, %v634_v9  ;;  %v644_v15 = vand.u32 2147483647, %v634_v9  ;;  %vm640_vm8 = vweird.f32 %v634_v9 }
 0x17e   : > { %v647_v17 = vor.u32 1.1754944e-38, %v646_v13  ;;  %vm645_vm10 = vcmp.eq.f32.partialorder %v644_v15, 8.507059e+37 }
 0x182   : > { %v971_v10 = vpop.eup %970 }
 0x183   : > { %v636_v11 = vmul.f32 %v971_v10, %v634_v9  ;;  %vm641_vm7 = vweird.f32 %v971_v10 }
 0x184   : > { %vm642_vm9 = vmor %vm640_vm8, %vm641_vm7 }
 0x185   : > { %v637_v12 = vsub.f32 1.0, %v636_v11 }
 0x187   : > { %v638_v14 = vmul.f32 %v971_v10, %v637_v12 }
 0x189   : > { %v639_v16 = vadd.f32 %v971_v10, %v638_v14 }
 0x18b   : > { %v643_v18 = vsel %vm642_vm9, %v971_v10, %v639_v16 }
 0x18c   : > { %v648_v19 = vsel %vm645_vm10, %v647_v17, %v643_v18 }
 0x18d   : > { %689 = vperm.xlu2 %961, %v648_v19   ;;  %v650_v20 = vsub.f32 1.0, %v648_v19 }
 0x18f   : > { %695 = vperm.xlu0 %960, %v650_v20  }
 0x1d9   : > { %v579_v26 = vpop.xlane.xlu1 %578 }
 0x1e6   : > { %v684_v21 = vpop.xlane.xlu2 %683 }
 0x1e7   : > { %972 = vrcp.f32 %v684_v21 }
 0x1e8   : > { %974 = vrcp.f32 %v579_v26 }
 0x1ed   : > { %v973_v22 = vpop.eup %972 }
 0x1ee   : > { %v686_v23 = vmul.f32 %v973_v22, %v967_v5  ;;  %v975_v27 = vpop.eup %974  ;;  %v690_v28 = vpop.permute.xlu2 %689 }
 0x1ef   : > { %v581_v29 = vmul.f32 %v975_v27, %v965_v58 }
 0x1f1   : > { %v692_v30 = vmul.f32 %v690_v28, %v581_v29 }
 0x201   : > { %v696_v24 = vpop.permute.xlu0 %695 }
 0x202   : > { %v698_v25 = vmul.f32 %v696_v24, %v686_v23 }
 0x204   : > { %700 = vrot.lane.b32.xlu1 %v698_v25, %s1143_s2 }
 0x276   : > { %v701_v31 = vpop.permute.xlu1 %700 }
 0x277   : > { %v703_v32 = vsel %vm570_vm4, %v692_v30, %v701_v31 }
 0x278   : > { %v704_v33 = vmax.f32 %v703_v32, 1e-09 }
 0x27a   : > { %v705_v34 = vmin.f32 %v704_v33, 1.0 }
 0x27c   : > { %976 = vlog2.f32 %v705_v34 }
 0x282   : > { %v977_v35 = vpop.eup %976 }
 0x283   : > { %v707_v36 = vmul.f32 0.6931472, %v977_v35 }
 0x285   : > { %709 = vst.msk [vmem:[%s497_s27] sm:$0xff] %vm708_vm11, %v707_v36 }
 0x286   : > { %1095 = shalt.err (!%p1092_p7)
}
 0x287   : > { %906 = dma.vmem_to_hbm [thread:$0]  (%p1248_p11), %s724_s13, 128, %s726_s14, %s711_s29  }
 0x288 PF: > { %s1484_s25 = sld [smem:[#allocation13_spill]]  ;;  %p919_p8 = pnand %p874_p9, %p1252_p12 }
 0x28a   : > { %p920_p10 = pneg %p919_p8 }
 0x28e   : > { %s737_s22 = sand.u32 1, %s1484_s25  }
 0x28f   : > { %s738_s2 = scalar_lea.sflag [#allocation5], %s737_s22 }
 0x290   : > { %1121 = dma.done.wait (%p920_p10), %s738_s2, 128  }
 0x291   : > { %1123 = vsyncadd (%p920_p10), %s738_s2, 4294967168  ;;  %s1487_s18 = sld [smem:[#allocation16_spill]]  ;;  %s1490_s15 = smov %s1130_s16 }
 0x292   : > { %s1488_s26 = sld [smem:[#allocation14_spill]] }
 0x293   : > { %s1489_s17 = sld [smem:[#allocation17_spill]] }
 0x297   : > { %p28_p1 = scmp.ge.s32.totalorder %s1487_s18, 4  }
 0x298   : > { %s1491_s16 = smov %s1488_s26 }
 0x299   :  { %30 = sbr.rel (!%p28_p1) target bundleno = 10 (0xa), region = 138 }
 0x29e   :  { %744 = vsyncpa [#allocation4], 1 }
 0x29f   :  { %746 = vsyncpa [#allocation4 + $0x1], 1 }
 0x2a0   :  { %747 = vsyncpa [#allocation7], 1 }
 0x2a1   :  { %749 = vsyncpa [#allocation7 + $0x1], 1 }
 0x2a2   :  { %750 = vsyncpa [#allocation5], 1 }
 0x2a3   :  { %752 = vsyncpa [#allocation5 + $0x1], 1 }

</bundles_post_ra>
